<compile_context>
chip_gen: v6e
topology: v6e:2x2x1
jax: 0.10.0
libtpu: 0.0.40
codegen_flags: <defaults>
</compile_context>

<pallas_src>
import numpy as np
import jax
import jax.numpy as jnp
from jax import lax
from jax.experimental import pallas as pl
from jax.experimental.pallas import tpu as pltpu


# --------------------------------------------------------------------------
# Kernel 1: fused "small head" (grid-less; pure overhead-bound)
#   weight = LayerNorm(controller(seg_query))
#   [wc|bc] = weight @ [w_bb ; b_bb]^T     (packed composed conv, one dot)
#   proj_* = F.normalize(Linear(.)); both bidirectional label-smoothed CE
#   losses computed in one block-diagonal masked pass.
# --------------------------------------------------------------------------
def _make_head_kernel(B, N, dim, Cin, ls=0.1, ln_eps=1e-5, l2_eps=1e-12):
    BN = B * N

    def _bidir_ce_blockdiag(a, b, inv_t):
        # a, b: (B*N, D).  S = a @ b^T / temp on the full (BN, BN) grid; the
        # per-batch (block-diagonal) label-smoothed CE is taken in BOTH
        # softmax directions in one pass (no per-b unrolled exp/log chains).
        S = lax.dot_general(a, b, (((1,), (1,)), ((), ())),
                            preferred_element_type=jnp.float32) * inv_t
        row = lax.broadcasted_iota(jnp.int32, (BN, BN), 0)
        col = lax.broadcasted_iota(jnp.int32, (BN, BN), 1)
        # batch id via float floor (robust, avoids integer vector division)
        inv_n = jnp.float32(1.0 / N)
        rowb = jnp.floor((row.astype(jnp.float32) + 0.5) * inv_n)
        colb = jnp.floor((col.astype(jnp.float32) + 0.5) * inv_n)
        same = rowb == colb
        smask = same.astype(jnp.float32)
        diag = (row == col).astype(jnp.float32)
        Sm = jnp.where(same, S, jnp.float32(-1e30))      # cross-batch ~ -inf

        # direction 0: softmax over rows (classes = rows of `a`), target(col j)=j
        m0 = jnp.max(Sm, axis=0, keepdims=True)
        lse0 = m0 + jnp.log(jnp.sum(jnp.exp(Sm - m0), axis=0, keepdims=True))
        lsm0 = Sm - lse0
        ce0 = -((1.0 - ls) * jnp.sum(lsm0 * diag, axis=0, keepdims=True)
                + (ls / N) * jnp.sum(lsm0 * smask, axis=0, keepdims=True))
        # direction 1: softmax over cols, target(row i)=i
        m1 = jnp.max(Sm, axis=1, keepdims=True)
        lse1 = m1 + jnp.log(jnp.sum(jnp.exp(Sm - m1), axis=1, keepdims=True))
        lsm1 = Sm - lse1
        ce1 = -((1.0 - ls) * jnp.sum(lsm1 * diag, axis=1, keepdims=True)
                + (ls / N) * jnp.sum(lsm1 * smask, axis=1, keepdims=True))
        return 0.5 * (jnp.mean(ce0) + jnp.mean(ce1))

    def kernel(seg_ref, ap_ref, tp_ref, pf_ref, pd_ref, temp_ref,
               wcbc_ref, loss_ref):
        seg = seg_ref[...]          # (B*N, dim)
        ap = ap_ref[...]            # (B*N, dim)
        tp = tp_ref[...]            # (B*N, dim)

        # slab_f rows: [w_ctrl (dim) | w_bb (Cin) | b_bb (1) | b_ctrl | ln_g | ln_b]
        w_ctrl = pf_ref[0:dim, :]                           # (dim, Cfeat)
        w_bbx = pf_ref[dim:dim + Cin + 1, :]                # (Cin+1, Cfeat) = [w_bb; b_bb]
        b_ctrl = pf_ref[dim + Cin + 1:dim + Cin + 2, :]     # (1, Cfeat)
        ln_g = pf_ref[dim + Cin + 2:dim + Cin + 3, :]
        ln_b = pf_ref[dim + Cin + 3:dim + Cin + 4, :]

        # weight = LayerNorm(controller(seg_query))
        y = jnp.dot(seg, w_ctrl, preferred_element_type=jnp.float32) + b_ctrl
        mu = jnp.mean(y, axis=-1, keepdims=True)
        var = jnp.mean((y - mu) ** 2, axis=-1, keepdims=True)
        weight = (y - mu) * lax.rsqrt(var + ln_eps) * ln_g + ln_b

        # Packed composed pointwise conv in ONE dot:
        #   cols 0..Cin-1 = weight @ w_bb^T,  col Cin = weight @ b_bb^T
        wcbc_ref[...] = lax.dot_general(
            weight, w_bbx, (((1,), (1,)), ((), ())),
            preferred_element_type=jnp.float32)             # (B*N, Cin+1)

        # slab_d rows: [w_q (dim) | w_ap (dim) | w_tp (dim) | b_q | b_ap | b_tp]
        w_q = pd_ref[0:dim, :]
        w_ap = pd_ref[dim:2 * dim, :]
        w_tp = pd_ref[2 * dim:3 * dim, :]
        b_q = pd_ref[3 * dim:3 * dim + 1, :]
        b_ap = pd_ref[3 * dim + 1:3 * dim + 2, :]
        b_tp = pd_ref[3 * dim + 2:3 * dim + 3, :]

        def l2n(x, w, b):
            v = jnp.dot(x, w, preferred_element_type=jnp.float32) + b
            nrm = jnp.sqrt(jnp.sum(v * v, axis=-1, keepdims=True))
            return v / jnp.maximum(nrm, l2_eps)

        proj_s = l2n(seg, w_q, b_q)
        proj_ap = l2n(ap, w_ap, b_ap)
        proj_tp = l2n(tp, w_tp, b_tp)

        inv_t = 1.0 / temp_ref[0, 0]
        loss_sv = _bidir_ce_blockdiag(proj_ap, proj_s, inv_t)   # (CE(i2s)+CE(s2i))/2
        loss_st = _bidir_ce_blockdiag(proj_s, proj_tp, inv_t)   # (CE(s2t)+CE(t2s))/2

        lane = lax.broadcasted_iota(jnp.int32, (1, 2), 1)
        loss_ref[...] = jnp.where(lane == 0, loss_sv, loss_st)  # packed [sv, st]

    return kernel


def prepare_params(p):
    """Concatenate the 13 tiny head parameters into two host-side slabs so the
    head kernel issues 2 parameter DMAs instead of 13 (review item)."""
    pf = jnp.concatenate(
        [p["w_ctrl"], p["w_bb"], p["b_bb"], p["b_ctrl"], p["ln_g"], p["ln_b"]],
        axis=0).astype(jnp.float32)                 # (dim + Cin + 4, Cfeat)
    pd = jnp.concatenate(
        [p["w_q"], p["w_ap"], p["w_tp"], p["b_q"], p["b_ap"], p["b_tp"]],
        axis=0).astype(jnp.float32)                 # (3*dim + 3, dim)
    return {"seg_query": p["seg_query"], "pf": pf, "pd": pd, "temp": p["temp"]}


def head_compose(seg2, ap2, tp2, pf, pd, temp, B, N, Cin):
    BN, dim = seg2.shape
    vmem = pl.BlockSpec(memory_space=pltpu.MemorySpace.VMEM)
    smem = pl.BlockSpec(memory_space=pltpu.MemorySpace.SMEM)
    return pl.pallas_call(
        _make_head_kernel(B, N, dim, Cin),
        out_shape=(
            jax.ShapeDtypeStruct((BN, Cin + 1), jnp.float32),  # packed [wc | bc]
            jax.ShapeDtypeStruct((1, 2), jnp.float32),         # packed [loss_sv, loss_st]
        ),
        in_specs=[vmem, vmem, vmem, vmem, vmem, smem],
        out_specs=(vmem, vmem),
    )(seg2, ap2, tp2, pf, pd, temp)


# --------------------------------------------------------------------------
# Kernel 2: fused backbone+logits:
#   logits[b, :, l_tile] = wc[b] @ x[b, :, l_tile] + bc[b]
# x is the NCDHW input viewed as (B, Cin, L): L on the lane axis, lane-dense
# output blocks.  Grid (B, cdiv(L, TL)), both axes parallel; wc/bc resident.
# --------------------------------------------------------------------------
def _fused_logits_kernel(x_ref, wc_ref, bc_ref, o_ref):
    # x: (1, Cin, TL); wc: (B, N, Cin) resident; bc: (B, N, 1) resident; o: (1, N, TL)
    b = pl.program_id(0)
    y = jnp.dot(wc_ref[b], x_ref[0], preferred_element_type=jnp.float32)
    o_ref[0] = (y + bc_ref[b]).astype(o_ref.dtype)


def _choose_l_tile(L, B, Cin, N, *, max_tile=32768, vmem_budget=24 * 1024 * 1024):
    """Largest lane-dense (multiple-of-128) L tile such that
       * the double-buffered x + logits blocks fit in `vmem_budget`,
       * TL <= max_tile (big tiles amortize the ~0.35us/step grid overhead),
       * B * cdiv(L, TL) >= 4 grid points so v7x's 2 TensorCores both get work."""
    if L <= 128:
        return L                                   # full extent: always legal
    # 2 buffers * 4 bytes * (Cin + N) bytes per lane of x + logits blocks
    fit = max(128, (vmem_budget // (8 * (Cin + N)) // 128) * 128)
    need_l_tiles = max(1, (4 + B - 1) // B)        # >= 4 grid points when possible
    grid_cap = max(128, (L // need_l_tiles // 128) * 128)
    l_round = ((L + 127) // 128) * 128
    return min(max_tile, fit, grid_cap, l_round)


def fused_logits(x_cl, wc, bc, *, out_dtype=jnp.float32, max_tile=32768):
    B, Cin, L = x_cl.shape
    N = wc.shape[1]
    TL = _choose_l_tile(L, B, Cin, N, max_tile=max_tile)
    grid = (B, pl.cdiv(L, TL))                     # partial last tile is masked
    cost = pl.CostEstimate(
        flops=2 * B * N * Cin * L,
        transcendentals=0,
        bytes_accessed=4 * B * L * (Cin + N) + 4 * B * N * (Cin + 1),
    )
    return pl.pallas_call(
        _fused_logits_kernel,
        out_shape=jax.ShapeDtypeStruct((B, N, L), out_dtype),
        grid=grid,
        in_specs=[
            pl.BlockSpec((1, Cin, TL), lambda b, l: (b, 0, l)),
            # wc/bc are tiny: keep them VMEM-resident for the whole kernel
            # (constant index_map -> a single DMA, no per-step re-fetch).
            pl.BlockSpec((B, N, Cin), lambda b, l: (0, 0, 0)),
            pl.BlockSpec((B, N, 1), lambda b, l: (0, 0, 0)),
        ],
        out_specs=pl.BlockSpec((1, N, TL), lambda b, l: (b, 0, l)),
        compiler_params=pltpu.CompilerParams(
            dimension_semantics=("parallel", "parallel"),
            vmem_limit_bytes=32 * 1024 * 1024,     # explicit; >= v5e default, <= v7x physical
        ),
        cost_estimate=cost,
    )(x_cl, wc, bc)


# --------------------------------------------------------------------------
# Full forward (glue in plain JAX, heavy compute in the two Pallas kernels)
# --------------------------------------------------------------------------
def cat_forward(x_in, ap_emb, tp_emb, params, *, logits_dtype=jnp.float32):
    # Note: set logits_dtype=jnp.bfloat16 (and feed x in bf16) to halve HBM
    # traffic on this ~1 FLOP/byte kernel if the consumer tolerates bf16.
    B, Cin, D, H, W = x_in.shape
    N, dim = params["seg_query"].shape
    L = D * H * W

    # NCDHW viewed as (B, Cin, L): free reshape, no transpose round-trip.
    x_cl = x_in.reshape(B, Cin, L)

    # Seg queries / prompt embeddings repeated over batch (attend/refine layers
    # are identity stand-ins; see TODO at top of file).
    seg2 = jnp.broadcast_to(params["seg_query"][None], (B, N, dim)).reshape(B * N, dim)
    ap2 = jnp.broadcast_to(ap_emb[None], (B, N, dim)).reshape(B * N, dim)
    tp2 = jnp.broadcast_to(tp_emb[None], (B, N, dim)).reshape(B * N, dim)

    wcbc2, losses = head_compose(seg2, ap2, tp2,
                                 params["pf"], params["pd"], params["temp"],
                                 B, N, Cin)
    wcbc = wcbc2.reshape(B, N, Cin + 1)
    wc = wcbc[:, :, :Cin]          # tiny host-side slices of the packed output
    bc = wcbc[:, :, Cin:]

    logits = fused_logits(x_cl, wc, bc, out_dtype=logits_dtype)     # (B, N, L)
    logits_out = logits.reshape(B, N, D, H, W)
    return logits_out, losses[0, 0], losses[0, 1]


# --------------------------------------------------------------------------
# Pure-JAX reference (same stubbed graph) for correctness check
# --------------------------------------------------------------------------
def _ref_forward(x_in, ap_emb, tp_emb, p):
    B, Cin, D, H, W = x_in.shape
    N, dim = p["seg_query"].shape
    L = D * H * W
    x_flat = jnp.transpose(x_in, (0, 2, 3, 4, 1)).reshape(B, L, Cin)
    out_flat = x_flat @ p["w_bb"] + p["b_bb"]

    seg_query = jnp.broadcast_to(p["seg_query"][None], (B, N, dim))
    batch_ap = jnp.broadcast_to(ap_emb[None], (B, N, dim))
    batch_tp = jnp.broadcast_to(tp_emb[None], (B, N, dim))

    y = seg_query @ p["w_ctrl"] + p["b_ctrl"]
    mu = jnp.mean(y, -1, keepdims=True)
    var = jnp.mean((y - mu) ** 2, -1, keepdims=True)
    weight = (y - mu) / jnp.sqrt(var + 1e-5) * p["ln_g"] + p["ln_b"]

    logits = jnp.einsum("bnc,blc->bnl", weight, out_flat).reshape(B, N, D, H, W)

    def l2n(x, w, b):
        v = x @ w + b
        return v / jnp.maximum(jnp.linalg.norm(v, axis=-1, keepdims=True), 1e-12)

    proj_s = l2n(seg_query, p["w_q"], p["b_q"])
    proj_ap = l2n(batch_ap, p["w_ap"], p["b_ap"])
    proj_tp = l2n(batch_tp, p["w_tp"], p["b_tp"])
    t = p["temp"][0, 0]

    def ce(sim):  # sim: (B, C, d), target[b, j] = j, label_smoothing = 0.1
        C = sim.shape[1]
        lsm = jax.nn.log_softmax(sim, axis=1)
        eye = jnp.eye(C)
        per = -((1 - 0.1) * jnp.einsum("bcd,cd->bd", lsm, eye)
                + (0.1 / C) * jnp.sum(lsm, axis=1))
        return jnp.mean(per)

    s_i2s = jnp.einsum("bnd,bmd->bnm", proj_ap, proj_s) / t
    s_s2t = jnp.einsum("bnd,bmd->bnm", proj_s, proj_tp) / t
    loss_sv = 0.5 * (ce(s_i2s) + ce(jnp.swapaxes(s_i2s, 1, 2)))
    loss_st = 0.5 * (ce(s_s2t) + ce(jnp.swapaxes(s_s2t, 1, 2)))
    return logits, loss_sv, loss_st


# --------------------------------------------------------------------------
def _run_case(key, B, Cin, D, H, W, N, dim, Cfeat):
    ks = jax.random.split(key, 12)
    x_in = jax.random.normal(ks[0], (B, Cin, D, H, W), jnp.float32)
    ap_emb = jax.random.normal(ks[1], (N, dim), jnp.float32)
    tp_emb = jax.random.normal(ks[2], (N, dim), jnp.float32)

    s = 0.02
    raw = {
        "w_bb": s * jax.random.normal(ks[3], (Cin, Cfeat), jnp.float32),
        "b_bb": s * jax.random.normal(ks[9], (1, Cfeat), jnp.float32),
        "seg_query": s * jax.random.normal(ks[4], (N, dim), jnp.float32),
        "w_ctrl": s * jax.random.normal(ks[5], (dim, Cfeat), jnp.float32),
        "b_ctrl": s * jax.random.normal(ks[10], (1, Cfeat), jnp.float32),
        "ln_g": 1.0 + s * jax.random.normal(ks[11], (1, Cfeat), jnp.float32),
        "ln_b": jnp.zeros((1, Cfeat), jnp.float32),
        "w_q": s * jax.random.normal(ks[6], (dim, dim), jnp.float32),
        "b_q": jnp.zeros((1, dim), jnp.float32),
        "w_ap": s * jax.random.normal(ks[7], (dim, dim), jnp.float32),
        "b_ap": jnp.zeros((1, dim), jnp.float32),
        "w_tp": s * jax.random.normal(ks[8], (dim, dim), jnp.float32),
        "b_tp": jnp.zeros((1, dim), jnp.float32),
        "temp": jnp.full((1, 1), 0.05, jnp.float32),
    }
    prepared = prepare_params(raw)

    logits_out, loss_sv, loss_st = cat_forward(x_in, ap_emb, tp_emb, prepared)
    jax.block_until_ready((logits_out, loss_sv, loss_st))

    ref_logits, ref_sv, ref_st = _ref_forward(x_in, ap_emb, tp_emb, raw)
    np.testing.assert_allclose(np.asarray(logits_out), np.asarray(ref_logits),
                               rtol=1e-3, atol=1e-3)
    np.testing.assert_allclose(float(loss_sv), float(ref_sv), rtol=1e-3, atol=1e-3)
    np.testing.assert_allclose(float(loss_st), float(ref_st), rtol=1e-3, atol=1e-3)


if __name__ == "__main__":
    key = jax.random.PRNGKey(0)
    k1, k2 = jax.random.split(key)
    # Case 1: L = 512 divides the tile -> (B, 2) grid, 4 grid points.
    _run_case(k1, B=2, Cin=4, D=8, H=8, W=8, N=4, dim=32, Cfeat=48)
    # Case 2: L = 576 does NOT divide the tile -> exercises the cdiv grid with
    # a masked partial last block (replaces the old single-tile fallback).
    _run_case(k2, B=2, Cin=4, D=8, H=8, W=9, N=4, dim=32, Cfeat=48)
    print("KERNEL_OK")
</pallas_src>

<mosaic_0001>
module attributes {stable_mosaic.version = 11 : i64} {
  func.func @kernel(%arg0: memref<8x32xf32, #tpu.memory_space<vmem>>, %arg1: memref<8x32xf32, #tpu.memory_space<vmem>>, %arg2: memref<8x32xf32, #tpu.memory_space<vmem>>, %arg3: memref<40x48xf32, #tpu.memory_space<vmem>>, %arg4: memref<99x32xf32, #tpu.memory_space<vmem>>, %arg5: memref<1x1xf32, #tpu.memory_space<smem>>, %arg6: memref<8x5xf32, #tpu.memory_space<vmem>>, %arg7: memref<1x2xf32, #tpu.memory_space<vmem>>) attributes {dimension_semantics = [], scalar_prefetch = 0 : i64, scratch_operands = 0 : i64, tpu.core_type = #tpu.core_type<tc>} {
    %c0 = arith.constant 0 : index
    %c0_0 = arith.constant 0 : index
    %0 = vector.load %arg0[%c0, %c0_0] : memref<8x32xf32, #tpu.memory_space<vmem>>, vector<8x32xf32>
    %c0_1 = arith.constant 0 : index
    %c0_2 = arith.constant 0 : index
    %1 = vector.load %arg1[%c0_1, %c0_2] : memref<8x32xf32, #tpu.memory_space<vmem>>, vector<8x32xf32>
    %c0_3 = arith.constant 0 : index
    %c0_4 = arith.constant 0 : index
    %2 = vector.load %arg2[%c0_3, %c0_4] : memref<8x32xf32, #tpu.memory_space<vmem>>, vector<8x32xf32>
    %c0_5 = arith.constant 0 : index
    %c0_6 = arith.constant 0 : index
    %3 = vector.load %arg3[%c0_5, %c0_6] : memref<40x48xf32, #tpu.memory_space<vmem>>, vector<32x48xf32>
    %c32 = arith.constant 32 : index
    %c0_7 = arith.constant 0 : index
    %4 = vector.load %arg3[%c32, %c0_7] : memref<40x48xf32, #tpu.memory_space<vmem>>, vector<5x48xf32>
    %c37 = arith.constant 37 : index
    %c0_8 = arith.constant 0 : index
    %5 = vector.load %arg3[%c37, %c0_8] : memref<40x48xf32, #tpu.memory_space<vmem>>, vector<1x48xf32>
    %c38 = arith.constant 38 : index
    %c0_9 = arith.constant 0 : index
    %6 = vector.load %arg3[%c38, %c0_9] : memref<40x48xf32, #tpu.memory_space<vmem>>, vector<1x48xf32>
    %c39 = arith.constant 39 : index
    %c0_10 = arith.constant 0 : index
    %7 = vector.load %arg3[%c39, %c0_10] : memref<40x48xf32, #tpu.memory_space<vmem>>, vector<1x48xf32>
    %cst = arith.constant dense<0.000000e+00> : vector<8x48xf32>
    %8 = tpu.matmul %0, %3, %cst {dimension_numbers = #tpu.dot_dimension_numbers<[1], [0], [0], [1], [0, 0, 1, 1], [], []>} : vector<8x32xf32>, vector<32x48xf32>, vector<8x48xf32> -> vector<8x48xf32>
    %9 = vector.broadcast %5 : vector<1x48xf32> to vector<8x48xf32>
    %10 = arith.addf %8, %9 : vector<8x48xf32>
    %cst_11 = arith.constant dense<0.000000e+00> : vector<8xf32>
    %11 = vector.multi_reduction <add>, %10, %cst_11 [1] : vector<8x48xf32> to vector<8xf32>
    %12 = vector.shape_cast %11 : vector<8xf32> to vector<8x1xf32>
    %cst_12 = arith.constant 4.800000e+01 : f32
    %13 = vector.broadcast %cst_12 : f32 to vector<8x1xf32>
    %14 = arith.divf %12, %13 : vector<8x1xf32>
    %15 = vector.broadcast %14 : vector<8x1xf32> to vector<8x48xf32>
    %16 = arith.subf %10, %15 : vector<8x48xf32>
    %17 = arith.mulf %16, %16 : vector<8x48xf32>
    %cst_13 = arith.constant dense<0.000000e+00> : vector<8xf32>
    %18 = vector.multi_reduction <add>, %17, %cst_13 [1] : vector<8x48xf32> to vector<8xf32>
    %19 = vector.shape_cast %18 : vector<8xf32> to vector<8x1xf32>
    %cst_14 = arith.constant 4.800000e+01 : f32
    %20 = vector.broadcast %cst_14 : f32 to vector<8x1xf32>
    %21 = arith.divf %19, %20 : vector<8x1xf32>
    %22 = vector.broadcast %14 : vector<8x1xf32> to vector<8x48xf32>
    %23 = arith.subf %10, %22 : vector<8x48xf32>
    %cst_15 = arith.constant 9.99999974E-6 : f32
    %24 = vector.broadcast %cst_15 : f32 to vector<8x1xf32>
    %25 = arith.addf %21, %24 : vector<8x1xf32>
    %26 = math.rsqrt %25 : vector<8x1xf32>
    %27 = vector.broadcast %26 : vector<8x1xf32> to vector<8x48xf32>
    %28 = arith.mulf %23, %27 : vector<8x48xf32>
    %29 = vector.broadcast %6 : vector<1x48xf32> to vector<8x48xf32>
    %30 = arith.mulf %28, %29 : vector<8x48xf32>
    %31 = vector.broadcast %7 : vector<1x48xf32> to vector<8x48xf32>
    %32 = arith.addf %30, %31 : vector<8x48xf32>
    %cst_16 = arith.constant dense<0.000000e+00> : vector<8x5xf32>
    %33 = tpu.matmul %32, %4, %cst_16 {dimension_numbers = #tpu.dot_dimension_numbers<[1], [1], [0], [0], [0, 0, 1, 0], [], []>} : vector<8x48xf32>, vector<5x48xf32>, vector<8x5xf32> -> vector<8x5xf32>
    %c0_17 = arith.constant 0 : index
    %c0_18 = arith.constant 0 : index
    %34 = vector.load %arg6[%c0_17, %c0_18] : memref<8x5xf32, #tpu.memory_space<vmem>>, vector<8x5xf32>
    tpu.vector_store %arg6[%c0_17, %c0_18], %33 {strides = array<i32>} : memref<8x5xf32, #tpu.memory_space<vmem>>, vector<8x5xf32>,
    %c0_19 = arith.constant 0 : index
    %c0_20 = arith.constant 0 : index
    %35 = vector.load %arg4[%c0_19, %c0_20] : memref<99x32xf32, #tpu.memory_space<vmem>>, vector<32x32xf32>
    %c32_21 = arith.constant 32 : index
    %c0_22 = arith.constant 0 : index
    %36 = vector.load %arg4[%c32_21, %c0_22] : memref<99x32xf32, #tpu.memory_space<vmem>>, vector<32x32xf32>
    %c64 = arith.constant 64 : index
    %c0_23 = arith.constant 0 : index
    %37 = vector.load %arg4[%c64, %c0_23] : memref<99x32xf32, #tpu.memory_space<vmem>>, vector<32x32xf32>
    %c96 = arith.constant 96 : index
    %c0_24 = arith.constant 0 : index
    %38 = vector.load %arg4[%c96, %c0_24] : memref<99x32xf32, #tpu.memory_space<vmem>>, vector<1x32xf32>
    %c97 = arith.constant 97 : index
    %c0_25 = arith.constant 0 : index
    %39 = vector.load %arg4[%c97, %c0_25] : memref<99x32xf32, #tpu.memory_space<vmem>>, vector<1x32xf32>
    %c98 = arith.constant 98 : index
    %c0_26 = arith.constant 0 : index
    %40 = vector.load %arg4[%c98, %c0_26] : memref<99x32xf32, #tpu.memory_space<vmem>>, vector<1x32xf32>
    %cst_27 = arith.constant dense<0.000000e+00> : vector<8x32xf32>
    %41 = tpu.matmul %0, %35, %cst_27 {dimension_numbers = #tpu.dot_dimension_numbers<[1], [0], [0], [1], [0, 0, 1, 1], [], []>} : vector<8x32xf32>, vector<32x32xf32>, vector<8x32xf32> -> vector<8x32xf32>
    %42 = vector.broadcast %38 : vector<1x32xf32> to vector<8x32xf32>
    %43 = arith.addf %41, %42 : vector<8x32xf32>
    %44 = arith.mulf %43, %43 : vector<8x32xf32>
    %cst_28 = arith.constant dense<0.000000e+00> : vector<8xf32>
    %45 = vector.multi_reduction <add>, %44, %cst_28 [1] : vector<8x32xf32> to vector<8xf32>
    %46 = vector.shape_cast %45 : vector<8xf32> to vector<8x1xf32>
    %47 = math.sqrt %46 : vector<8x1xf32>
    %cst_29 = arith.constant 9.99999996E-13 : f32
    %48 = vector.broadcast %cst_29 : f32 to vector<8x1xf32>
    %49 = arith.maximumf %47, %48 : vector<8x1xf32>
    %50 = vector.broadcast %49 : vector<8x1xf32> to vector<8x32xf32>
    %51 = arith.divf %43, %50 : vector<8x32xf32>
    %cst_30 = arith.constant dense<0.000000e+00> : vector<8x32xf32>
    %52 = tpu.matmul %1, %36, %cst_30 {dimension_numbers = #tpu.dot_dimension_numbers<[1], [0], [0], [1], [0, 0, 1, 1], [], []>} : vector<8x32xf32>, vector<32x32xf32>, vector<8x32xf32> -> vector<8x32xf32>
    %53 = vector.broadcast %39 : vector<1x32xf32> to vector<8x32xf32>
    %54 = arith.addf %52, %53 : vector<8x32xf32>
    %55 = arith.mulf %54, %54 : vector<8x32xf32>
    %cst_31 = arith.constant dense<0.000000e+00> : vector<8xf32>
    %56 = vector.multi_reduction <add>, %55, %cst_31 [1] : vector<8x32xf32> to vector<8xf32>
    %57 = vector.shape_cast %56 : vector<8xf32> to vector<8x1xf32>
    %58 = math.sqrt %57 : vector<8x1xf32>
    %cst_32 = arith.constant 9.99999996E-13 : f32
    %59 = vector.broadcast %cst_32 : f32 to vector<8x1xf32>
    %60 = arith.maximumf %58, %59 : vector<8x1xf32>
    %61 = vector.broadcast %60 : vector<8x1xf32> to vector<8x32xf32>
    %62 = arith.divf %54, %61 : vector<8x32xf32>
    %cst_33 = arith.constant dense<0.000000e+00> : vector<8x32xf32>
    %63 = tpu.matmul %2, %37, %cst_33 {dimension_numbers = #tpu.dot_dimension_numbers<[1], [0], [0], [1], [0, 0, 1, 1], [], []>} : vector<8x32xf32>, vector<32x32xf32>, vector<8x32xf32> -> vector<8x32xf32>
    %64 = vector.broadcast %40 : vector<1x32xf32> to vector<8x32xf32>
    %65 = arith.addf %63, %64 : vector<8x32xf32>
    %66 = arith.mulf %65, %65 : vector<8x32xf32>
    %cst_34 = arith.constant dense<0.000000e+00> : vector<8xf32>
    %67 = vector.multi_reduction <add>, %66, %cst_34 [1] : vector<8x32xf32> to vector<8xf32>
    %68 = vector.shape_cast %67 : vector<8xf32> to vector<8x1xf32>
    %69 = math.sqrt %68 : vector<8x1xf32>
    %cst_35 = arith.constant 9.99999996E-13 : f32
    %70 = vector.broadcast %cst_35 : f32 to vector<8x1xf32>
    %71 = arith.maximumf %69, %70 : vector<8x1xf32>
    %72 = vector.broadcast %71 : vector<8x1xf32> to vector<8x32xf32>
    %73 = arith.divf %65, %72 : vector<8x32xf32>
    %c0_36 = arith.constant 0 : index
    %c0_37 = arith.constant 0 : index
    %74 = memref.load %arg5[%c0_36, %c0_37] : memref<1x1xf32, #tpu.memory_space<smem>>
    %cst_38 = arith.constant 1.000000e+00 : f32
    %75 = arith.divf %cst_38, %74 : f32
    %cst_39 = arith.constant dense<0.000000e+00> : vector<8x8xf32>
    %76 = tpu.matmul %62, %51, %cst_39 {dimension_numbers = #tpu.dot_dimension_numbers<[1], [1], [0], [0], [0, 0, 1, 0], [], []>} : vector<8x32xf32>, vector<8x32xf32>, vector<8x8xf32> -> vector<8x8xf32>
    %77 = vector.broadcast %75 : f32 to vector<8x8xf32>
    %78 = arith.mulf %76, %77 : vector<8x8xf32>
    %79 = tpu.iota {dimensions = array<i32: 0>} : vector<8x8xi32>
    %80 = tpu.iota {dimensions = array<i32: 1>} : vector<8x8xi32>
    %81 = arith.sitofp %79 : vector<8x8xi32> to vector<8x8xf32>
    %cst_40 = arith.constant 5.000000e-01 : f32
    %82 = vector.broadcast %cst_40 : f32 to vector<8x8xf32>
    %83 = arith.addf %81, %82 : vector<8x8xf32>
    %cst_41 = arith.constant 2.500000e-01 : f32
    %84 = vector.broadcast %cst_41 : f32 to vector<8x8xf32>
    %85 = arith.mulf %83, %84 : vector<8x8xf32>
    %86 = math.floor %85 : vector<8x8xf32>
    %87 = arith.sitofp %80 : vector<8x8xi32> to vector<8x8xf32>
    %cst_42 = arith.constant 5.000000e-01 : f32
    %88 = vector.broadcast %cst_42 : f32 to vector<8x8xf32>
    %89 = arith.addf %87, %88 : vector<8x8xf32>
    %cst_43 = arith.constant 2.500000e-01 : f32
    %90 = vector.broadcast %cst_43 : f32 to vector<8x8xf32>
    %91 = arith.mulf %89, %90 : vector<8x8xf32>
    %92 = math.floor %91 : vector<8x8xf32>
    %93 = arith.cmpf oeq, %86, %92 : vector<8x8xf32>
    %94 = arith.extui %93 : vector<8x8xi1> to vector<8x8xi32>
    %95 = arith.sitofp %94 : vector<8x8xi32> to vector<8x8xf32>
    %96 = arith.cmpi eq, %79, %80 : vector<8x8xi32>
    %97 = arith.extui %96 : vector<8x8xi1> to vector<8x8xi32>
    %98 = arith.sitofp %97 : vector<8x8xi32> to vector<8x8xf32>
    %cst_44 = arith.constant -1.000000e+30 : f32
    %99 = vector.broadcast %cst_44 : f32 to vector<8x8xf32>
    %100 = arith.select %93, %78, %99 : vector<8x8xi1>, vector<8x8xf32>
    %cst_45 = arith.constant dense<0xFF800000> : vector<8xf32>
    %101 = vector.multi_reduction <maximumf>, %100, %cst_45 [0] : vector<8x8xf32> to vector<8xf32>
    %102 = vector.shape_cast %101 : vector<8xf32> to vector<1x8xf32>
    %103 = vector.broadcast %102 : vector<1x8xf32> to vector<8x8xf32>
    %104 = arith.subf %100, %103 : vector<8x8xf32>
    %105 = math.exp %104 : vector<8x8xf32>
    %cst_46 = arith.constant dense<0.000000e+00> : vector<8xf32>
    %106 = vector.multi_reduction <add>, %105, %cst_46 [0] : vector<8x8xf32> to vector<8xf32>
    %107 = vector.shape_cast %106 : vector<8xf32> to vector<1x8xf32>
    %108 = math.log %107 : vector<1x8xf32>
    %109 = arith.addf %102, %108 : vector<1x8xf32>
    %110 = vector.broadcast %109 : vector<1x8xf32> to vector<8x8xf32>
    %111 = arith.subf %100, %110 : vector<8x8xf32>
    %112 = arith.mulf %111, %98 : vector<8x8xf32>
    %cst_47 = arith.constant dense<0.000000e+00> : vector<8xf32>
    %113 = vector.multi_reduction <add>, %112, %cst_47 [0] : vector<8x8xf32> to vector<8xf32>
    %114 = vector.shape_cast %113 : vector<8xf32> to vector<1x8xf32>
    %cst_48 = arith.constant 0.899999976 : f32
    %115 = vector.broadcast %cst_48 : f32 to vector<1x8xf32>
    %116 = arith.mulf %115, %114 : vector<1x8xf32>
    %117 = arith.mulf %111, %95 : vector<8x8xf32>
    %cst_49 = arith.constant dense<0.000000e+00> : vector<8xf32>
    %118 = vector.multi_reduction <add>, %117, %cst_49 [0] : vector<8x8xf32> to vector<8xf32>
    %119 = vector.shape_cast %118 : vector<8xf32> to vector<1x8xf32>
    %cst_50 = arith.constant 2.500000e-02 : f32
    %120 = vector.broadcast %cst_50 : f32 to vector<1x8xf32>
    %121 = arith.mulf %120, %119 : vector<1x8xf32>
    %122 = arith.addf %116, %121 : vector<1x8xf32>
    %cst_51 = arith.constant 0.000000e+00 : f32
    %123 = vector.broadcast %cst_51 : f32 to vector<1x8xf32>
    %124 = arith.subf %123, %122 : vector<1x8xf32>
    %cst_52 = arith.constant dense<0xFF800000> : vector<8xf32>
    %125 = vector.multi_reduction <maximumf>, %100, %cst_52 [1] : vector<8x8xf32> to vector<8xf32>
    %126 = vector.shape_cast %125 : vector<8xf32> to vector<8x1xf32>
    %127 = vector.broadcast %126 : vector<8x1xf32> to vector<8x8xf32>
    %128 = arith.subf %100, %127 : vector<8x8xf32>
    %129 = math.exp %128 : vector<8x8xf32>
    %cst_53 = arith.constant dense<0.000000e+00> : vector<8xf32>
    %130 = vector.multi_reduction <add>, %129, %cst_53 [1] : vector<8x8xf32> to vector<8xf32>
    %131 = vector.shape_cast %130 : vector<8xf32> to vector<8x1xf32>
    %132 = math.log %131 : vector<8x1xf32>
    %133 = arith.addf %126, %132 : vector<8x1xf32>
    %134 = vector.broadcast %133 : vector<8x1xf32> to vector<8x8xf32>
    %135 = arith.subf %100, %134 : vector<8x8xf32>
    %136 = arith.mulf %135, %98 : vector<8x8xf32>
    %cst_54 = arith.constant dense<0.000000e+00> : vector<8xf32>
    %137 = vector.multi_reduction <add>, %136, %cst_54 [1] : vector<8x8xf32> to vector<8xf32>
    %138 = vector.shape_cast %137 : vector<8xf32> to vector<8x1xf32>
    %cst_55 = arith.constant 0.899999976 : f32
    %139 = vector.broadcast %cst_55 : f32 to vector<8x1xf32>
    %140 = arith.mulf %139, %138 : vector<8x1xf32>
    %141 = arith.mulf %135, %95 : vector<8x8xf32>
    %cst_56 = arith.constant dense<0.000000e+00> : vector<8xf32>
    %142 = vector.multi_reduction <add>, %141, %cst_56 [1] : vector<8x8xf32> to vector<8xf32>
    %143 = vector.shape_cast %142 : vector<8xf32> to vector<8x1xf32>
    %cst_57 = arith.constant 2.500000e-02 : f32
    %144 = vector.broadcast %cst_57 : f32 to vector<8x1xf32>
    %145 = arith.mulf %144, %143 : vector<8x1xf32>
    %146 = arith.addf %140, %145 : vector<8x1xf32>
    %cst_58 = arith.constant 0.000000e+00 : f32
    %147 = vector.broadcast %cst_58 : f32 to vector<8x1xf32>
    %148 = arith.subf %147, %146 : vector<8x1xf32>
    %149 = vector.shape_cast %124 : vector<1x8xf32> to vector<1x1x8xf32>
    %cst_59 = arith.constant dense<0.000000e+00> : vector<1xf32>
    %150 = vector.multi_reduction <add>, %149, %cst_59 [1, 2] : vector<1x1x8xf32> to vector<1xf32>
    %151 = vector.shape_cast %150 : vector<1xf32> to vector<1x1x1xf32>
    %152 = vector.extract %151[0, 0, 0] : f32 from vector<1x1x1xf32>
    %cst_60 = arith.constant 8.000000e+00 : f32
    %153 = arith.divf %152, %cst_60 : f32
    %154 = vector.shape_cast %148 : vector<8x1xf32> to vector<1x8x1xf32>
    %cst_61 = arith.constant dense<0.000000e+00> : vector<1xf32>
    %155 = vector.multi_reduction <add>, %154, %cst_61 [1, 2] : vector<1x8x1xf32> to vector<1xf32>
    %156 = vector.shape_cast %155 : vector<1xf32> to vector<1x1x1xf32>
    %157 = vector.extract %156[0, 0, 0] : f32 from vector<1x1x1xf32>
    %cst_62 = arith.constant 8.000000e+00 : f32
    %158 = arith.divf %157, %cst_62 : f32
    %159 = arith.addf %153, %158 : f32
    %cst_63 = arith.constant 5.000000e-01 : f32
    %160 = arith.mulf %cst_63, %159 : f32
    %cst_64 = arith.constant dense<0.000000e+00> : vector<8x8xf32>
    %161 = tpu.matmul %51, %73, %cst_64 {dimension_numbers = #tpu.dot_dimension_numbers<[1], [1], [0], [0], [0, 0, 1, 0], [], []>} : vector<8x32xf32>, vector<8x32xf32>, vector<8x8xf32> -> vector<8x8xf32>
    %162 = vector.broadcast %75 : f32 to vector<8x8xf32>
    %163 = arith.mulf %161, %162 : vector<8x8xf32>
    %164 = tpu.iota {dimensions = array<i32: 0>} : vector<8x8xi32>
    %165 = tpu.iota {dimensions = array<i32: 1>} : vector<8x8xi32>
    %166 = arith.sitofp %164 : vector<8x8xi32> to vector<8x8xf32>
    %cst_65 = arith.constant 5.000000e-01 : f32
    %167 = vector.broadcast %cst_65 : f32 to vector<8x8xf32>
    %168 = arith.addf %166, %167 : vector<8x8xf32>
    %cst_66 = arith.constant 2.500000e-01 : f32
    %169 = vector.broadcast %cst_66 : f32 to vector<8x8xf32>
    %170 = arith.mulf %168, %169 : vector<8x8xf32>
    %171 = math.floor %170 : vector<8x8xf32>
    %172 = arith.sitofp %165 : vector<8x8xi32> to vector<8x8xf32>
    %cst_67 = arith.constant 5.000000e-01 : f32
    %173 = vector.broadcast %cst_67 : f32 to vector<8x8xf32>
    %174 = arith.addf %172, %173 : vector<8x8xf32>
    %cst_68 = arith.constant 2.500000e-01 : f32
    %175 = vector.broadcast %cst_68 : f32 to vector<8x8xf32>
    %176 = arith.mulf %174, %175 : vector<8x8xf32>
    %177 = math.floor %176 : vector<8x8xf32>
    %178 = arith.cmpf oeq, %171, %177 : vector<8x8xf32>
    %179 = arith.extui %178 : vector<8x8xi1> to vector<8x8xi32>
    %180 = arith.sitofp %179 : vector<8x8xi32> to vector<8x8xf32>
    %181 = arith.cmpi eq, %164, %165 : vector<8x8xi32>
    %182 = arith.extui %181 : vector<8x8xi1> to vector<8x8xi32>
    %183 = arith.sitofp %182 : vector<8x8xi32> to vector<8x8xf32>
    %cst_69 = arith.constant -1.000000e+30 : f32
    %184 = vector.broadcast %cst_69 : f32 to vector<8x8xf32>
    %185 = arith.select %178, %163, %184 : vector<8x8xi1>, vector<8x8xf32>
    %cst_70 = arith.constant dense<0xFF800000> : vector<8xf32>
    %186 = vector.multi_reduction <maximumf>, %185, %cst_70 [0] : vector<8x8xf32> to vector<8xf32>
    %187 = vector.shape_cast %186 : vector<8xf32> to vector<1x8xf32>
    %188 = vector.broadcast %187 : vector<1x8xf32> to vector<8x8xf32>
    %189 = arith.subf %185, %188 : vector<8x8xf32>
    %190 = math.exp %189 : vector<8x8xf32>
    %cst_71 = arith.constant dense<0.000000e+00> : vector<8xf32>
    %191 = vector.multi_reduction <add>, %190, %cst_71 [0] : vector<8x8xf32> to vector<8xf32>
    %192 = vector.shape_cast %191 : vector<8xf32> to vector<1x8xf32>
    %193 = math.log %192 : vector<1x8xf32>
    %194 = arith.addf %187, %193 : vector<1x8xf32>
    %195 = vector.broadcast %194 : vector<1x8xf32> to vector<8x8xf32>
    %196 = arith.subf %185, %195 : vector<8x8xf32>
    %197 = arith.mulf %196, %183 : vector<8x8xf32>
    %cst_72 = arith.constant dense<0.000000e+00> : vector<8xf32>
    %198 = vector.multi_reduction <add>, %197, %cst_72 [0] : vector<8x8xf32> to vector<8xf32>
    %199 = vector.shape_cast %198 : vector<8xf32> to vector<1x8xf32>
    %cst_73 = arith.constant 0.899999976 : f32
    %200 = vector.broadcast %cst_73 : f32 to vector<1x8xf32>
    %201 = arith.mulf %200, %199 : vector<1x8xf32>
    %202 = arith.mulf %196, %180 : vector<8x8xf32>
    %cst_74 = arith.constant dense<0.000000e+00> : vector<8xf32>
    %203 = vector.multi_reduction <add>, %202, %cst_74 [0] : vector<8x8xf32> to vector<8xf32>
    %204 = vector.shape_cast %203 : vector<8xf32> to vector<1x8xf32>
    %cst_75 = arith.constant 2.500000e-02 : f32
    %205 = vector.broadcast %cst_75 : f32 to vector<1x8xf32>
    %206 = arith.mulf %205, %204 : vector<1x8xf32>
    %207 = arith.addf %201, %206 : vector<1x8xf32>
    %cst_76 = arith.constant 0.000000e+00 : f32
    %208 = vector.broadcast %cst_76 : f32 to vector<1x8xf32>
    %209 = arith.subf %208, %207 : vector<1x8xf32>
    %cst_77 = arith.constant dense<0xFF800000> : vector<8xf32>
    %210 = vector.multi_reduction <maximumf>, %185, %cst_77 [1] : vector<8x8xf32> to vector<8xf32>
    %211 = vector.shape_cast %210 : vector<8xf32> to vector<8x1xf32>
    %212 = vector.broadcast %211 : vector<8x1xf32> to vector<8x8xf32>
    %213 = arith.subf %185, %212 : vector<8x8xf32>
    %214 = math.exp %213 : vector<8x8xf32>
    %cst_78 = arith.constant dense<0.000000e+00> : vector<8xf32>
    %215 = vector.multi_reduction <add>, %214, %cst_78 [1] : vector<8x8xf32> to vector<8xf32>
    %216 = vector.shape_cast %215 : vector<8xf32> to vector<8x1xf32>
    %217 = math.log %216 : vector<8x1xf32>
    %218 = arith.addf %211, %217 : vector<8x1xf32>
    %219 = vector.broadcast %218 : vector<8x1xf32> to vector<8x8xf32>
    %220 = arith.subf %185, %219 : vector<8x8xf32>
    %221 = arith.mulf %220, %183 : vector<8x8xf32>
    %cst_79 = arith.constant dense<0.000000e+00> : vector<8xf32>
    %222 = vector.multi_reduction <add>, %221, %cst_79 [1] : vector<8x8xf32> to vector<8xf32>
    %223 = vector.shape_cast %222 : vector<8xf32> to vector<8x1xf32>
    %cst_80 = arith.constant 0.899999976 : f32
    %224 = vector.broadcast %cst_80 : f32 to vector<8x1xf32>
    %225 = arith.mulf %224, %223 : vector<8x1xf32>
    %226 = arith.mulf %220, %180 : vector<8x8xf32>
    %cst_81 = arith.constant dense<0.000000e+00> : vector<8xf32>
    %227 = vector.multi_reduction <add>, %226, %cst_81 [1] : vector<8x8xf32> to vector<8xf32>
    %228 = vector.shape_cast %227 : vector<8xf32> to vector<8x1xf32>
    %cst_82 = arith.constant 2.500000e-02 : f32
    %229 = vector.broadcast %cst_82 : f32 to vector<8x1xf32>
    %230 = arith.mulf %229, %228 : vector<8x1xf32>
    %231 = arith.addf %225, %230 : vector<8x1xf32>
    %cst_83 = arith.constant 0.000000e+00 : f32
    %232 = vector.broadcast %cst_83 : f32 to vector<8x1xf32>
    %233 = arith.subf %232, %231 : vector<8x1xf32>
    %234 = vector.shape_cast %209 : vector<1x8xf32> to vector<1x1x8xf32>
    %cst_84 = arith.constant dense<0.000000e+00> : vector<1xf32>
    %235 = vector.multi_reduction <add>, %234, %cst_84 [1, 2] : vector<1x1x8xf32> to vector<1xf32>
    %236 = vector.shape_cast %235 : vector<1xf32> to vector<1x1x1xf32>
    %237 = vector.extract %236[0, 0, 0] : f32 from vector<1x1x1xf32>
    %cst_85 = arith.constant 8.000000e+00 : f32
    %238 = arith.divf %237, %cst_85 : f32
    %239 = vector.shape_cast %233 : vector<8x1xf32> to vector<1x8x1xf32>
    %cst_86 = arith.constant dense<0.000000e+00> : vector<1xf32>
    %240 = vector.multi_reduction <add>, %239, %cst_86 [1, 2] : vector<1x8x1xf32> to vector<1xf32>
    %241 = vector.shape_cast %240 : vector<1xf32> to vector<1x1x1xf32>
    %242 = vector.extract %241[0, 0, 0] : f32 from vector<1x1x1xf32>
    %cst_87 = arith.constant 8.000000e+00 : f32
    %243 = arith.divf %242, %cst_87 : f32
    %244 = arith.addf %238, %243 : f32
    %cst_88 = arith.constant 5.000000e-01 : f32
    %245 = arith.mulf %cst_88, %244 : f32
    %246 = tpu.iota {dimensions = array<i32: 1>} : vector<1x2xi32>
    %c0_i32 = arith.constant 0 : i32
    %247 = vector.broadcast %c0_i32 : i32 to vector<1x2xi32>
    %248 = arith.cmpi eq, %246, %247 : vector<1x2xi32>
    %249 = vector.broadcast %160 : f32 to vector<1x2xf32>
    %250 = vector.broadcast %245 : f32 to vector<1x2xf32>
    %251 = arith.select %248, %249, %250 : vector<1x2xi1>, vector<1x2xf32>
    %c0_89 = arith.constant 0 : index
    %c0_90 = arith.constant 0 : index
    %252 = vector.load %arg7[%c0_89, %c0_90] : memref<1x2xf32, #tpu.memory_space<vmem>>, vector<1x2xf32>
    tpu.vector_store %arg7[%c0_89, %c0_90], %251 {strides = array<i32>} : memref<1x2xf32, #tpu.memory_space<vmem>>, vector<1x2xf32>,
    return
  }
}

</mosaic_0001>

<bundles_post_ra>
// kernel: tpu_custom_call.1
= control target key start
LH: loop header
LB: loop body
LE: loop exit
PB: predicated region body
PF: predicated region fallthrough
CT: control target
= control target key end

     0   :  { %14 = vsyncpa [#allocation4], 0  ;;  %v1097_v1 = vmov 0.0   ;;  %vm1098_vm0 = vmmov 0   ;;  %s1333_s0 = inlined_call_operand.vmem [shape: f32[8,32], index: 0, kind: input, shape index: {}]   ;;  %s1334_s1 = inlined_call_operand.vmem [shape: f32[8,32], index: 1, kind: input, shape index: {}]   ;;  %s1335_s2 = inlined_call_operand.vmem [shape: f32[8,32], index: 2, kind: input, shape index: {}]   ;;  %s1336_s3 = inlined_call_operand.vmem [shape: f32[40,48], index: 3, kind: input, shape index: {}]   ;;  %s1337_s4 = inlined_call_operand.vmem [shape: f32[99,32], index: 4, kind: input, shape index: {}]   ;;  %s1338_s5 = inlined_call_operand.<no memory space> [shape: f32[1,1], index: 5, kind: input, shape index: {}]   ;;  %s1339_s6 = inlined_call_operand.hbm [shape: f32[8,5], index: 6, kind: output, shape index: {0}]   ;;  %s1340_s7 = inlined_call_operand.hbm [shape: f32[1,2], index: 7, kind: output, shape index: {1}]  }
   0x1   :  { %v34_v0 = vld [vmem:[%s1336_s3 + $0x18] sm:$0xff]  ;;  %948 = vmatprep.subr.mxu0 %v1097_v1  ;;  %v33_v2 = vld [vmem:[%s1336_s3 + $0x10] sm:$0xff]  ;;  %956 = vmatprep.mubr.msk.f32.mxu0 %vm1098_vm0, %v1097_v1 }
   0x2   :  { %949 = vmatpush3.msra.mxu0 %v34_v0  ;;  %959 = vmatprep.subr.mxu1 %v1097_v1 }
   0x3   :  { %15 = vsyncpa [#allocation6], 0  ;;  %950 = vmatprep.subr.mxu0 %v1097_v1  ;;  %v32_v3 = vld [vmem:[%s1336_s3 + $0x8] sm:$0xff]  ;;  %961 = vmatprep.mubr.msk.f32.mxu1 %vm1098_vm0, %v1097_v1  ;;  %v31_v4 = vld [vmem:[%s1336_s3] sm:$0xff]  ;;  %vm43_vm1 = vcmask 261120   ;;  %vm117_vm2 = vcmask 392192   ;;  %v506_v60 = vstv %s1338_s5 }
   0x4   :  { %951 = vmatpush3.msra.mxu0 %v33_v2  ;;  %v28_v5 = vld [vmem:[%s1333_s0] sm:$0xff]  ;;  %v227_v17 = vld [vmem:[%s1337_s4 + $0x38] sm:$0xff]  ;;  %v226_v18 = vld [vmem:[%s1337_s4 + $0x30] sm:$0xff]  ;;  %vm218_vm3 = vcmask 39936   ;;  %vm606_vm11 = vcmask 64512   ;;  %vm672_vm13 = vcmask 57344  }
   0x5   :  { %952 = vmatprep.subr.mxu0 %v1097_v1  ;;  %v904_v6 = vld [vmem:[%s1336_s3 + $0x25] ss:$0 sm:$0xff]  ;;  %v35_v16 = vld [vmem:[%s1336_s3 + $0x20] sm:$0x1f]  ;;  %v225_v19 = vld [vmem:[%s1337_s4 + $0x28] sm:$0xff]  ;;  %vm686_vm14 = vcmask 7168  }
   0x6   :  { %953 = vmatpush3.msra.mxu0 %v32_v3  ;;  %960 = vmatpush3.xpose.msk.msra.mxu1 %vm117_vm2, %v35_v16  ;;  %v224_v20 = vld [vmem:[%s1337_s4 + $0x20] sm:$0xff]  ;;  %v223_v31 = vld [vmem:[%s1337_s4 + $0x18] sm:$0xff]  ;;  %v222_v32 = vld [vmem:[%s1337_s4 + $0x10] sm:$0xff]  ;;  %s1099_s5 = smov [#allocation3]  }
   0x7   :  { %954 = vmatprep.subr.mxu0 %v1097_v1  ;;  %964 = vmatprep.subr.mxu1 %v1097_v1  ;;  %v29_v21 = vld [vmem:[%s1334_s1] sm:$0xff]  ;;  %v221_v33 = vld [vmem:[%s1337_s4 + $0x8] sm:$0xff]  ;;  %v231_v35 = vld [vmem:[%s1337_s4 + $0x58] sm:$0xff]  ;;  %s882_s27 = sshll.u32 %s1099_s5, 4  ;;  %s883_s27 = int_to_ptr.vmem [resolvable:$true] %s882_s27 }
   0x8   :  { %955 = vmatpush3.msra.mxu0 %v31_v4  ;;  %v906_v26 = vld [vmem:[%s1336_s3 + $0x26] ss:$0 sm:$0xff]  ;;  %v907_v28 = vld [vmem:[%s1336_s3 + $0x27] ss:$0 sm:$0xff]  ;;  %v230_v36 = vld [vmem:[%s1337_s4 + $0x50] sm:$0xff]  ;;  %s1053_s1 = scalar_lea.vmem %s883_s27, 128  ;;  %p1058_p1 = scmp.lt.s32.totalorder %s883_s27, %s883_s27 }
   0x9   :  { %957 = vmatmul.mubr.msk.f32.vlgmr.msra.gmra.mxu0 %vm43_vm1, %v28_v5  ;;  %975 = vmatprep.subr.mxu0 %v1097_v1  ;;  %v220_v34 = vld [vmem:[%s1337_s4] sm:$0xff]  ;;  %v229_v37 = vld [vmem:[%s1337_s4 + $0x48] sm:$0xff]  ;;  %p1054_p0 = scmp.ne.s32.totalorder %s883_s27, %s1053_s1  ;;  %p1059_p2 = scmp.lt.s32.totalorder %s1053_s1, %s1053_s1 }
   0xa   :  { %983 = vmatprep.mubr.msk.f32.mxu0 %vm1098_vm0, %v1097_v1  ;;  %976 = vmatpush3.msra.mxu0 %v227_v17  ;;  %v228_v38 = vld [vmem:[%s1337_s4 + $0x40] sm:$0xff] }
   0xb   :  { %977 = vmatprep.subr.mxu0 %v1097_v1  ;;  %v30_v39 = vld [vmem:[%s1335_s2] sm:$0xff]  ;;  %p1060_p3 = por %p1059_p2, %p1058_p1 }
   0xc   :  { %978 = vmatpush3.msra.mxu0 %v226_v18  ;;  %v912_v44 = vld [vmem:[%s1337_s4 + $0x61] ss:$0 sm:$0xff]  ;;  %v910_v45 = vld [vmem:[%s1337_s4 + $0x60] ss:$0 sm:$0xff]  ;;  %v914_v53 = vld [vmem:[%s1337_s4 + $0x62] ss:$0 sm:$0xff] }
   0xd   :  { %979 = vmatprep.subr.mxu0 %v1097_v1  ;;  %p1061_p4 = pnand %p1060_p3, %p1054_p0 }
   0xe   :  { %980 = vmatpush3.msra.mxu0 %v225_v19 }
   0xf   :  { %981 = vmatprep.subr.mxu0 %v1097_v1 }
  0x10   :  { %982 = vmatpush3.msra.mxu0 %v224_v20 }
  0x11   :  { %984 = vmatmul.mubr.msk.f32.vlgmr.msra.gmra.mxu0 %vm43_vm1, %v29_v21  ;;  %997 = vmatprep.subr.mxu0 %v1097_v1 }
  0x12   :  { %999 = vmatprep.mubr.msk.f32.mxu0 %vm1098_vm0, %v1097_v1 }
  0xc9   :  { %v113_v7 = vpop.f32.mrf.mxu0 }
  0xca   :  { %v114_v8 = vadd.f32 %v904_v6, %v113_v7 }
  0xcb   :  { %v958_v9 = vpop.f32.mrf.mxu0 }
  0xcc   :  { %v118_v10 = vsel %vm117_vm2, %v114_v8, 0.0 }
  0xcd   :  { %119 = vadd.xlane.f32.xlu0 %v118_v10 }
  0xd1   :  { %v396_v40 = vpop.f32.mrf.mxu0 }
  0xd2   :  { %v397_v46 = vadd.f32 %v912_v44, %v396_v40 }
  0xd3   :  { %v985_v41 = vpop.f32.mrf.mxu0 }
  0xd4   :  { %v400_v51 = vmul.f32 %v397_v46, %v397_v46 }
  0xd6   :  { %v401_v54 = vsel %vm43_vm1, %v400_v51, 0.0 }
 0x156   :  { %v120_v11 = vpop.xlane.xlu0 %119 }
 0x157   :  { %v122_v12 = vmul.f32 0.020833334, %v120_v11 }
 0x159   :  { %v123_v13 = vsub.f32 %v114_v8, %v122_v12 }
 0x15b   :  { %v124_v14 = vmul.f32 %v123_v13, %v123_v13 }
 0x15d   :  { %v125_v15 = vsel %vm117_vm2, %v124_v14, 0.0 }
 0x15e   :  { %126 = vadd.xlane.f32.xlu0 %v125_v15 }
 0x1e7   :  { %v127_v22 = vpop.xlane.xlu0 %126 }
 0x1e8   :  { %v128_v23 = vmul.f32 0.020833334, %v127_v22 }
 0x1ea   :  { %v129_v24 = vadd.f32 1e-05, %v128_v23 }
 0x1ec   :  { %1021 = vrsqrt.f32 %v129_v24 }
 0x1ed   :  { %1023 = vrcp.f32 %v506_v60 }
 0x1f9   :  { %v1022_v25 = vpop.eup %1021 }
 0x1fa   :  { %v131_v27 = vmul.f32 %v1022_v25, %v123_v13  ;;  %v1024_v61 = vpop.eup %1023 }
 0x1fb   :  { %1007 = vpush %v1024_v61 }
 0x1fc   :  { %v136_v29 = vmul.f32 %v906_v26, %v131_v27  ;;  %v587_v26 = vlaneseq }
 0x1fe   :  { %v141_v30 = vadd.f32 %v907_v28, %v136_v29  ;;  %v1270_v27 = vshrl.u32 %v587_v26, 7  ;;  %v1272_v28 = vand.u32 127, %v587_v26 }
 0x200   :  { %962 = vmatmul.mubr.msk.f32.vlgmr.msra.gmra.mxu1 %vm117_vm2, %v141_v30  ;;  %v591_v29 = vcvt.s32.f32 %v1270_v27  ;;  %v595_v30 = vcvt.s32.f32 %v1272_v28  ;;  %vm602_vm12 = vcmp.eq.s32.totalorder %v1270_v27, %v1272_v28 }
 0x201   :  { %965 = vmatpush3.msra.mxu1 %v223_v31  ;;  %972 = vmatprep.mubr.msk.f32.mxu1 %vm1098_vm0, %v1097_v1 }
 0x202   :  { %966 = vmatprep.subr.mxu1 %v1097_v1  ;;  %v592_v31 = vadd.f32 0.5, %v591_v29 }
 0x203   :  { %967 = vmatpush3.msra.mxu1 %v222_v32  ;;  %v596_v32 = vadd.f32 0.5, %v595_v30 }
 0x204   :  { %968 = vmatprep.subr.mxu1 %v1097_v1 }
 0x205   :  { %969 = vmatpush3.msra.mxu1 %v221_v33  ;;  %v593_v33 = vmul.f32 0.25, %v592_v31 }
 0x206   :  { %970 = vmatprep.subr.mxu1 %v1097_v1 }
 0x207   :  { %971 = vmatpush3.msra.mxu1 %v220_v34  ;;  %v597_v34 = vmul.f32 0.25, %v596_v32 }
 0x208   :  { %973 = vmatmul.mubr.msk.f32.vlgmr.msra.gmra.mxu1 %vm43_vm1, %v28_v5  ;;  %986 = vmatprep.subr.mxu1 %v1097_v1 }
 0x209   :  { %987 = vmatpush3.msra.mxu1 %v231_v35  ;;  %994 = vmatprep.mubr.msk.f32.mxu1 %vm1098_vm0, %v1097_v1  ;;  %v594_v35 = vfloor.f32 %v593_v33 }
 0x20a   :  { %988 = vmatprep.subr.mxu1 %v1097_v1 }
 0x20b   :  { %989 = vmatpush3.msra.mxu1 %v230_v36  ;;  %v598_v36 = vfloor.f32 %v597_v34 }
 0x20c   :  { %990 = vmatprep.subr.mxu1 %v1097_v1 }
 0x20d   :  { %991 = vmatpush3.msra.mxu1 %v229_v37  ;;  %vm1276_vm10 = vcmp.eq.f32.partialorder %v594_v35, %v598_v36 }
 0x20e   :  { %992 = vmatprep.subr.mxu1 %v1097_v1 }
 0x20f   :  { %993 = vmatpush3.msra.mxu1 %v228_v38 }
 0x210   :  { %995 = vmatmul.mubr.msk.f32.vlgmr.msra.gmra.mxu1 %vm43_vm1, %v30_v39 }
 0x22c   :  { %s1008_s4 = spop %1007 }
 0x22d   :  { %v585_v37 = vstv %s1008_s4 }
 0x2c0   :  { %v214_v42 = vpop.f32.mrf.mxu1 }
 0x2c1   :  { %219 = vst.msk [vmem:[#allocation3] sm:$0xff] %vm218_vm3, %v214_v42 }
 0x2c2   :  { %v963_v43 = vpop.f32.mrf.mxu1 }
 0x2c8   :  { %v305_v47 = vpop.f32.mrf.mxu1 }
 0x2c9   :  { %v306_v48 = vadd.f32 %v910_v45, %v305_v47 }
 0x2ca   :  { %v974_v49 = vpop.f32.mrf.mxu1 }
 0x2cb   :  { %v309_v50 = vmul.f32 %v306_v48, %v306_v48 }
 0x2cd   :  { %v310_v52 = vsel %vm43_vm1, %v309_v50, 0.0 }
 0x2ce   :  { %311 = vadd.xlane.f32.xlu1 %v310_v52 }
 0x2d0   :  { %v487_v55 = vpop.f32.mrf.mxu1 }
 0x2d1   :  { %v488_v56 = vadd.f32 %v914_v53, %v487_v55 }
 0x2d2   :  { %v996_v57 = vpop.f32.mrf.mxu1  ;;  %402 = vadd.xlane.f32.xlu1 %v401_v54 }
 0x2d3   :  { %v491_v58 = vmul.f32 %v488_v56, %v488_v56 }
 0x2d5   :  { %v492_v59 = vsel %vm43_vm1, %v491_v58, 0.0 }
 0x2d6   :  { %493 = vadd.xlane.f32.xlu0 %v492_v59 }
 0x357   :  { %v312_v62 = vpop.xlane.xlu1 %311 }
 0x358   :  { %1025 = vrsqrt.f32 %v312_v62  ;;  %vm315_vm4 = vcmp.eq.f32.partialorder %v312_v62, inf  ;;  %v318_v4 = vand.u32 2147483648, %v312_v62  ;;  %vm317_vm5 = vcmp.eq.f32.partialorder %v312_v62, 0.0 }
 0x35b   :  { %v403_v63 = vpop.xlane.xlu1 %402 }
 0x35c   :  { %1027 = vrsqrt.f32 %v403_v63  ;;  %vm406_vm6 = vcmp.eq.f32.partialorder %v403_v63, inf  ;;  %v409_v10 = vand.u32 2147483648, %v403_v63  ;;  %vm408_vm7 = vcmp.eq.f32.partialorder %v403_v63, 0.0 }
 0x35f   :  { %v494_v0 = vpop.xlane.xlu0 %493 }
 0x360   :  { %1029 = vrsqrt.f32 %v494_v0  ;;  %vm497_vm8 = vcmp.eq.f32.partialorder %v494_v0, inf  ;;  %v500_v16 = vand.u32 2147483648, %v494_v0  ;;  %vm499_vm9 = vcmp.eq.f32.partialorder %v494_v0, 0.0 }
 0x365   :  { %v1026_v2 = vpop.eup %1025 }
 0x366   :  { %v314_v3 = vmul.f32 %v1026_v2, %v312_v62 }
 0x368   :  { %v316_v5 = vsel %vm315_vm4, %v312_v62, %v314_v3 }
 0x369   :  { %v1028_v6 = vpop.eup %1027  ;;  %v319_v7 = vsel %vm317_vm5, %v318_v4, %v316_v5 }
 0x36a   :  { %v320_v8 = vmax.f32 %v319_v7, 1e-12  ;;  %v405_v9 = vmul.f32 %v1028_v6, %v403_v63 }
 0x36c   :  { %1031 = vrcp.f32 %v320_v8  ;;  %v407_v11 = vsel %vm406_vm6, %v403_v63, %v405_v9 }
 0x36d   :  { %v1030_v12 = vpop.eup %1029  ;;  %v410_v13 = vsel %vm408_vm7, %v409_v10, %v407_v11 }
 0x36e   :  { %v411_v14 = vmax.f32 %v410_v13, 1e-12  ;;  %v496_v15 = vmul.f32 %v1030_v12, %v494_v0 }
 0x370   :  { %1033 = vrcp.f32 %v411_v14  ;;  %v498_v17 = vsel %vm497_vm8, %v494_v0, %v496_v15 }
 0x371   :  { %v501_v18 = vsel %vm499_vm9, %v500_v16, %v498_v17 }
 0x372   :  { %v502_v19 = vmax.f32 %v501_v18, 1e-12 }
 0x374   :  { %1035 = vrcp.f32 %v502_v19 }
 0x379   :  { %v1032_v20 = vpop.eup %1031 }
 0x37a   :  { %v322_v21 = vmul.f32 %v1032_v20, %v306_v48 }
 0x37c   :  { %998 = vmatpush3.xpose.msk.msra.mxu0 %vm43_vm1, %v322_v21 }
 0x37d   :  { %v1034_v22 = vpop.eup %1033  ;;  %1002 = vmatprep.subr.mxu0 %v1097_v1 }
 0x37e   :  { %v413_v23 = vmul.f32 %v1034_v22, %v397_v46 }
 0x380   :  { %1000 = vmatmul.mubr.msk.f32.vlgmr.msra.gmra.mxu0 %vm43_vm1, %v413_v23 }
 0x381   :  { %v1036_v24 = vpop.eup %1035  ;;  %1004 = vmatprep.mubr.msk.f32.mxu0 %vm1098_vm0, %v1097_v1 }
 0x382   :  { %v504_v25 = vmul.f32 %v1036_v24, %v488_v56 }
 0x384   :  { %1003 = vmatpush3.xpose.msk.msra.mxu0 %vm43_vm1, %v504_v25 }
 0x387   :  { %1005 = vmatmul.mubr.msk.f32.vlgmr.msra.gmra.mxu0 %vm43_vm1, %v322_v21 }
 0x440   :  { %v581_v38 = vpop.f32.mrf.mxu0 }
 0x441   :  { %v586_v40 = vmul.f32 %v585_v37, %v581_v38  ;;  %v918_v38 = vsel %vm1276_vm10, 1.0, %v1097_v1 }
 0x442   :  { %v1001_v41 = vpop.f32.mrf.mxu0 }
 0x443   :  { %v1282_v42 = vsel %vm1276_vm10, %v586_v40, -1e+30 }
 0x444   :  { %v607_v43 = vsel %vm606_vm11, %v1282_v42, -inf }
 0x445   :  { %648 = vmax.xlane.f32.xlu1 %v607_v43  ;;  %v608_v59 = vrot.slane %v607_v43, 4 }
 0x447   :  { %v771_v44 = vpop.f32.mrf.mxu0  ;;  %v609_v60 = vmax.f32 %v607_v43, %v608_v59 }
 0x448   :  { %v775_v45 = vmul.f32 %v771_v44, %v585_v37  ;;  %v919_v37 = vsel %vm602_vm12, 1.0, %v1097_v1 }
 0x449   :  { %v1006_v46 = vpop.f32.mrf.mxu0  ;;  %v610_v62 = vrot.slane %v609_v60, 2 }
 0x44a   :  { %v1288_v47 = vsel %vm1276_vm10, %v775_v45, -1e+30 }
 0x44b   :  { %v777_v48 = vsel %vm606_vm11, %v1288_v47, -inf  ;;  %v611_v0 = vmax.f32 %v609_v60, %v610_v62 }
 0x44c   :  { %818 = vmax.xlane.f32.xlu0 %v777_v48  ;;  %v778_v61 = vrot.slane %v777_v48, 4 }
 0x44d   :  { %v612_v3 = vrot.slane %v611_v0, 1 }
 0x44e   :  { %v779_v63 = vmax.f32 %v777_v48, %v778_v61 }
 0x44f   :  { %v613_v5 = vmax.f32 %v611_v0, %v612_v3 }
 0x450   :  { %v780_v2 = vrot.slane %v779_v63, 2 }
 0x451   :  { %v614_v7 = vsub.f32 %v1282_v42, %v613_v5 }
 0x452   :  { %v781_v4 = vmax.f32 %v779_v63, %v780_v2 }
 0x453   :  { %v615_v9 = vmul.f32 1.442695, %v614_v7 }
 0x454   :  { %v782_v6 = vrot.slane %v781_v4, 1 }
 0x456   :  { %v783_v8 = vmax.f32 %v781_v4, %v782_v6 }
 0x458   :  { %v784_v10 = vsub.f32 %v1288_v47, %v783_v8 }
 0x45a   :  { %v785_v11 = vmul.f32 1.442695, %v784_v10 }
 0x4ce   :  { %v1292_v49 = vpop.xlane.xlu1 %648 }
 0x4cf   :  { %v650_v50 = vsub.f32 %v1282_v42, %v1292_v49 }
 0x4d1   :  { %v651_v51 = vmul.f32 1.442695, %v650_v50 }
 0x4d3   :  { %1037 = vpow2.f32 %v651_v51 }
 0x4d5   :  { %v1296_v52 = vpop.xlane.xlu0 %818 }
 0x4d6   :  { %v820_v53 = vsub.f32 %v1288_v47, %v1296_v52 }
 0x4d8   :  { %v821_v54 = vmul.f32 1.442695, %v820_v53 }
 0x4da   :  { %1039 = vpow2.f32 %v821_v54 }
 0x4db   :  { %1041 = vpow2.f32 %v615_v9 }
 0x4dc   :  { %1043 = vpow2.f32 %v785_v11 }
 0x4e0   :  { %v1038_v55 = vpop.eup %1037 }
 0x4e1   :  { %v653_v56 = vsel %vm606_vm11, %v1038_v55, 0.0 }
 0x4e2   :  { %654 = vadd.xlane.f32.xlu1 %v653_v56 }
 0x4e7   :  { %v1040_v57 = vpop.eup %1039 }
 0x4e8   :  { %v823_v58 = vsel %vm606_vm11, %v1040_v57, 0.0  ;;  %v1042_v12 = vpop.eup %1041 }
 0x4e9   :  { %824 = vadd.xlane.f32.xlu0 %v823_v58  ;;  %v617_v13 = vsel %vm606_vm11, %v1042_v12, 0.0  ;;  %v1044_v14 = vpop.eup %1043 }
 0x4ea   :  { %v618_v15 = vrot.slane %v617_v13, 4  ;;  %v787_v16 = vsel %vm606_vm11, %v1044_v14, 0.0 }
 0x4eb   :  { %v788_v18 = vrot.slane %v787_v16, 4 }
 0x4ec   :  { %v619_v17 = vadd.f32 %v618_v15, %v617_v13 }
 0x4ed   :  { %v789_v20 = vadd.f32 %v788_v18, %v787_v16 }
 0x4ee   :  { %v620_v19 = vrot.slane %v619_v17, 2 }
 0x4ef   :  { %v790_v22 = vrot.slane %v789_v20, 2 }
 0x4f0   :  { %v621_v21 = vadd.f32 %v620_v19, %v619_v17 }
 0x4f1   :  { %v791_v24 = vadd.f32 %v790_v22, %v789_v20 }
 0x4f2   :  { %v622_v23 = vrot.slane %v621_v21, 1 }
 0x4f3   :  { %v792_v26 = vrot.slane %v791_v24, 1 }
 0x4f4   :  { %v623_v25 = vadd.f32 %v622_v23, %v621_v21 }
 0x4f5   :  { %v793_v29 = vadd.f32 %v792_v26, %v791_v24 }
 0x4f6   :  { %1045 = vlog2.f32 %v623_v25 }
 0x4f7   :  { %1047 = vlog2.f32 %v793_v29 }
 0x503   :  { %v1046_v30 = vpop.eup %1045 }
 0x504   :  { %v625_v31 = vmul.f32 0.6931472, %v1046_v30  ;;  %v1048_v32 = vpop.eup %1047 }
 0x505   :  { %v795_v34 = vmul.f32 0.6931472, %v1048_v32 }
 0x506   :  { %v626_v33 = vadd.f32 %v625_v31, %v613_v5 }
 0x507   :  { %v796_v36 = vadd.f32 %v795_v34, %v783_v8 }
 0x508   :  { %v627_v35 = vsub.f32 %v1282_v42, %v626_v33 }
 0x509   :  { %v797_v41 = vsub.f32 %v1288_v47, %v796_v36 }
 0x50a   :  { %v628_v40 = vmul.f32 %v919_v37, %v627_v35  ;;  %v637_v43 = vmul.f32 %v918_v38, %v627_v35 }
 0x50b   :  { %v798_v45 = vmul.f32 %v919_v37, %v797_v41  ;;  %v807_v46 = vmul.f32 %v918_v38, %v797_v41 }
 0x50c   :  { %v629_v44 = vsel %vm606_vm11, %v628_v40, 0.0  ;;  %v638_v48 = vsel %vm606_vm11, %v637_v43, 0.0 }
 0x50d   :  { %v630_v27 = vrot.slane %v629_v44, 4  ;;  %v639_v50 = vrot.slane %v638_v48, 4  ;;  %v799_v51 = vsel %vm606_vm11, %v798_v45, 0.0  ;;  %v808_v53 = vsel %vm606_vm11, %v807_v46, 0.0 }
 0x50e   :  { %v800_v55 = vrot.slane %v799_v51, 4  ;;  %v809_v56 = vrot.slane %v808_v53, 4 }
 0x50f   :  { %v631_v39 = vadd.f32 %v630_v27, %v629_v44  ;;  %v640_v1 = vadd.f32 %v639_v50, %v638_v48 }
 0x510   :  { %v801_v59 = vadd.f32 %v800_v55, %v799_v51  ;;  %v810_v60 = vadd.f32 %v809_v56, %v808_v53 }
 0x511   :  { %v632_v57 = vrot.slane %v631_v39, 2  ;;  %v641_v58 = vrot.slane %v640_v1, 2 }
 0x512   :  { %v802_v0 = vrot.slane %v801_v59, 2  ;;  %v811_v2 = vrot.slane %v810_v60, 2 }
 0x513   :  { %v633_v62 = vadd.f32 %v632_v57, %v631_v39  ;;  %v642_v63 = vadd.f32 %v641_v58, %v640_v1 }
 0x514   :  { %v803_v6 = vadd.f32 %v802_v0, %v801_v59  ;;  %v812_v7 = vadd.f32 %v811_v2, %v810_v60 }
 0x515   :  { %v634_v3 = vrot.slane %v633_v62, 1  ;;  %v643_v5 = vrot.slane %v642_v63, 1 }
 0x516   :  { %v804_v12 = vrot.slane %v803_v6, 1  ;;  %v813_v13 = vrot.slane %v812_v7, 1 }
 0x517   :  { %v635_v10 = vadd.f32 %v634_v3, %v633_v62  ;;  %v644_v11 = vadd.f32 %v643_v5, %v642_v63 }
 0x518   :  { %v805_v21 = vadd.f32 %v804_v12, %v803_v6  ;;  %v814_v22 = vadd.f32 %v813_v13, %v812_v7 }
 0x519   :  { %v636_v18 = vmul.f32 0.9, %v635_v10  ;;  %v645_v20 = vmul.f32 0.025, %v644_v11 }
 0x51a   :  { %v815_v29 = vmul.f32 0.025, %v814_v22 }
 0x51b   :  { %v646_v26 = vadd.f32 %v645_v20, %v636_v18 }
 0x51d   :  { %v647_v34 = vsub.f32 0.0, %v646_v26 }
 0x51f   :  { %v673_v36 = vsel %vm672_vm13, %v647_v34, 0.0 }
 0x56b   :  { %v655_v54 = vpop.xlane.xlu1 %654 }
 0x56c   :  { %1049 = vlog2.f32 %v655_v54 }
 0x572   :  { %v825_v61 = vpop.xlane.xlu0 %824 }
 0x573   :  { %1051 = vlog2.f32 %v825_v61 }
 0x579   :  { %v1050_v4 = vpop.eup %1049 }
 0x57a   :  { %v657_v8 = vmul.f32 0.6931472, %v1050_v4 }
 0x57c   :  { %v658_v9 = vadd.f32 %v657_v8, %v1292_v49 }
 0x57e   :  { %v659_v14 = vsub.f32 %v1282_v42, %v658_v9  ;;  %v806_v42 = vmul.f32 0.9, %v805_v21 }
 0x580   :  { %v1052_v15 = vpop.eup %1051  ;;  %v660_v16 = vmul.f32 %v919_v37, %v659_v14  ;;  %v665_v17 = vmul.f32 %v918_v38, %v659_v14  ;;  %v816_v35 = vadd.f32 %v815_v29, %v806_v42 }
 0x581   :  { %v827_v19 = vmul.f32 0.6931472, %v1052_v15 }
 0x582   :  { %v661_v23 = vsel %vm606_vm11, %v660_v16, 0.0  ;;  %v666_v24 = vsel %vm606_vm11, %v665_v17, 0.0 }
 0x583   :  { %v828_v49 = vadd.f32 %v827_v19, %v1296_v52  ;;  %662 = vadd.xlane.f32.xlu1 %v661_v23  ;;  %667 = vadd.xlane.f32.xlu0 %v666_v24  ;;  %v817_v52 = vsub.f32 0.0, %v816_v35 }
 0x585   :  { %v829_v25 = vsub.f32 %v1288_v47, %v828_v49  ;;  %v842_v40 = vsel %vm672_vm13, %v817_v52, 0.0 }
 0x587   :  { %v835_v30 = vmul.f32 %v918_v38, %v829_v25  ;;  %v830_v31 = vmul.f32 %v919_v37, %v829_v25 }
 0x589   :  { %v836_v32 = vsel %vm606_vm11, %v835_v30, 0.0  ;;  %v831_v33 = vsel %vm606_vm11, %v830_v31, 0.0 }
 0x58a   :  { %837 = vadd.xlane.f32.xlu0 %v836_v32  ;;  %832 = vadd.xlane.f32.xlu1 %v831_v33 }
 0x58e   :  { %674 = vadd.xlane.f32.xlu1 %v673_v36 }
 0x592   :  { %843 = vadd.xlane.f32.xlu1 %v842_v40 }
 0x60c   :  { %v663_v47 = vpop.xlane.xlu1 %662  ;;  %v668_v41 = vpop.xlane.xlu0 %667 }
 0x60d   :  { %v664_v43 = vmul.f32 0.9, %v663_v47  ;;  %v669_v44 = vmul.f32 0.025, %v668_v41 }
 0x60f   :  { %v670_v38 = vadd.f32 %v669_v44, %v664_v43 }
 0x611   :  { %v671_v37 = vsub.f32 0.0, %v670_v38 }
 0x613   :  { %v833_v45 = vpop.xlane.xlu1 %832  ;;  %v838_v46 = vpop.xlane.xlu0 %837  ;;  %v687_v48 = vsel %vm686_vm14, %v671_v37, 0.0 }
 0x614   :  { %v834_v27 = vmul.f32 0.9, %v833_v45  ;;  %v839_v50 = vmul.f32 0.025, %v838_v46  ;;  %688 = vadd.xlane.f32.xlu0 %v687_v48 }
 0x616   :  { %v840_v51 = vadd.f32 %v839_v50, %v834_v27 }
 0x617   :  { %v675_v53 = vpop.xlane.xlu1 %674 }
 0x618   :  { %v676_v54 = vrot.slane %v675_v53, 4  ;;  %v841_v39 = vsub.f32 0.0, %v840_v51 }
 0x61a   :  { %v677_v1 = vadd.f32 %v676_v54, %v675_v53  ;;  %v855_v55 = vsel %vm686_vm14, %v841_v39, 0.0 }
 0x61b   :  { %856 = vadd.xlane.f32.xlu0 %v855_v55 }
 0x61c   :  { %v678_v56 = vrot.slane %v677_v1, 2 }
 0x61e   :  { %v679_v57 = vadd.f32 %v678_v56, %v677_v1 }
 0x620   :  { %v680_v58 = vrot.slane %v679_v57, 1 }
 0x622   :  { %v681_v59 = vadd.f32 %v680_v58, %v679_v57 }
 0x624   :  { %1009 = vpush %v681_v59 }
 0x625   :  { %1064 = shalt.err (!%p1061_p4)
}
 0x626   :  { %885 = dma.vmem_to_hbm [thread:$0]  %s883_s27, 128, %s1339_s6, [#allocation4]   ;;  %v844_v60 = vpop.xlane.xlu1 %843  ;;  %vm870_vm15 = vcmp.eq.s32.totalorder %v1272_v28, 0  ;;  %vm874_vm0 = vcmask 8192  }
 0x627   :  { %v845_v61 = vrot.slane %v844_v60, 4  ;;  %s1100_s15 = smov [#allocation5]  }
 0x628   :  { %s892_s16 = sshll.u32 %s1100_s15, 4  ;;  %s893_s16 = int_to_ptr.vmem [resolvable:$true] %s892_s16 }
 0x629   :  { %v846_v62 = vadd.f32 %v845_v61, %v844_v60  ;;  %s1073_s18 = scalar_lea.vmem %s893_s16, 16  ;;  %s1077_s19 = scalar_lea.vmem %s893_s16, 32 }
 0x62a   :  { %p1074_p5 = scmp.ne.s32.totalorder %s893_s16, %s1073_s18  ;;  %p1078_p6 = scmp.lt.s32.totalorder %s893_s16, %s893_s16 }
 0x62b   :  { %v847_v63 = vrot.slane %v846_v62, 2  ;;  %p1079_p7 = scmp.lt.s32.totalorder %s1077_s19, %s1073_s18 }
 0x62d   :  { %v848_v4 = vadd.f32 %v847_v63, %v846_v62  ;;  %p1080_p8 = por %p1079_p7, %p1078_p6 }
 0x62f   :  { %v849_v9 = vrot.slane %v848_v4, 1  ;;  %p1081_p9 = pnand %p1080_p8, %p1074_p5 }
 0x631   :  { %v850_v14 = vadd.f32 %v849_v9, %v848_v4 }
 0x655   :  { %s1010_s6 = spop %1009 }
 0x656   :  { %s685_s3 = smul.f32 0.125, %s1010_s6 }
 0x69d   :  { %v689_v0 = vpop.xlane.xlu0 %688 }
 0x69e   :  { %v690_v2 = vrot.slane %v689_v0, 4 }
 0x6a0   :  { %v691_v3 = vadd.f32 %v690_v2, %v689_v0 }
 0x6a2   :  { %v692_v5 = vrot.slane %v691_v3, 2 }
 0x6a4   :  { %v857_v6 = vpop.xlane.xlu0 %856  ;;  %v693_v7 = vadd.f32 %v692_v5, %v691_v3 }
 0x6a5   :  { %v858_v8 = vrot.slane %v857_v6, 4 }
 0x6a6   :  { %v694_v10 = vrot.slane %v693_v7, 1 }
 0x6a7   :  { %v859_v11 = vadd.f32 %v858_v8, %v857_v6 }
 0x6a8   :  { %v695_v12 = vadd.f32 %v694_v10, %v693_v7 }
 0x6a9   :  { %v860_v13 = vrot.slane %v859_v11, 2 }
 0x6aa   :  { %1011 = vpush %v695_v12 }
 0x6ab   :  { %v861_v15 = vadd.f32 %v860_v13, %v859_v11  ;;  %1013 = vpush %v850_v14 }
 0x6ad   :  { %v862_v16 = vrot.slane %v861_v15, 1 }
 0x6af   :  { %v863_v17 = vadd.f32 %v862_v16, %v861_v15 }
 0x6b1   :  { %1015 = vpush %v863_v17 }
 0x6db   :  { %s1012_s30 = spop %1011 }
 0x6dc   :  { %s699_s8 = smul.f32 0.125, %s1012_s30  ;;  %s1014_s9 = spop %1013 }
 0x6dd   :  { %s854_s11 = smul.f32 0.125, %s1014_s9 }
 0x6de   :  { %s700_s10 = sadd.f32 %s699_s8, %s685_s3 }
 0x6e0   :  { %s701_s13 = smul.f32 0.5, %s700_s10 }
 0x6e2   :  { %s1016_s12 = spop %1015  ;;  %v871_v18 = vstv %s701_s13 }
 0x6e3   :  { %s867_s0 = smul.f32 0.125, %s1016_s12 }
 0x6e5   :  { %s868_s14 = sadd.f32 %s867_s0, %s854_s11 }
 0x6e7   :  { %s869_s17 = smul.f32 0.5, %s868_s14 }
 0x6e9   :  { %v872_v19 = vstv %s869_s17 }
 0x6ea   :  { %v873_v20 = vsel %vm870_vm15, %v871_v18, %v872_v19 }
 0x6eb   :  { %875 = vst.msk [vmem:[#allocation5] sm:$0x1] %vm874_vm0, %v873_v20 }
 0x6ec   :  { %1084 = shalt.err (!%p1081_p9)
}
 0x6ed   :  { %895 = dma.vmem_to_hbm [thread:$0]  %s893_s16, 16, %s1340_s7, [#allocation6]  }
 0x6ee   :  { %1093 = dma.done.wait [#allocation4], 128  }
 0x6ef   :  { %1094 = vsyncadd [#allocation4], 4294967168 }
 0x6f0   :  { %1095 = dma.done.wait [#allocation6], 16  }
 0x6f1   :  { %1096 = vsyncadd [#allocation6], 4294967280 }
 0x6f2   :  { %902 = vsyncpa [#allocation4], 1 }
 0x6f3   :  { %903 = vsyncpa [#allocation6], 1 }

</bundles_post_ra>
